<compile_context>
chip_gen: v5e
topology: v5e:2x2
jax: 0.10.0
libtpu: 0.0.40
codegen_flags: <defaults>
</compile_context>

<pallas_src>
import functools

import jax
import jax.numpy as jnp
from jax import lax
from jax.experimental import pallas as pl
from jax.experimental.pallas import tpu as pltpu

_LANE = 128
_SUBLANE = 8


def _cdiv(a, b):
    return -(-a // b)


def _round_up(a, b):
    return _cdiv(a, b) * b


def _tracking_loss_kernel(packed_ref, cam_ref, out_ref, acc_ref, *,
                          tiles_per_split, tile_elems, n_valid, total_elems):
    s = pl.program_id(0)              # split (core-parallel on v7x)
    t = pl.program_id(1)              # tile within split (reduction axis)

    @pl.when(t == 0)
    def _init():
        acc_ref[...] = jnp.zeros_like(acc_ref)

    # Dense (R, 128) component slabs: full sublane + lane vreg occupancy.
    py = packed_ref[0]                 # position[:, 0]
    px = packed_ref[1]                 # position[:, 1]
    x = packed_ref[2]                  # target x
    y = packed_ref[3]                  # target y
    z = packed_ref[4]                  # target z

    # Camera coefficients: scalar SMEM loads splatted into vector FMAs.
    c00 = cam_ref[0, 0]; c01 = cam_ref[0, 1]; c02 = cam_ref[0, 2]; c03 = cam_ref[0, 3]
    c10 = cam_ref[1, 0]; c11 = cam_ref[1, 1]; c12 = cam_ref[1, 2]; c13 = cam_ref[1, 3]
    c30 = cam_ref[3, 0]; c31 = cam_ref[3, 1]; c32 = cam_ref[3, 2]; c33 = cam_ref[3, 3]

    # Unrolled projection ([xyz, 1] @ cam.T): only rows 0, 1, 3 are ever used.
    s0 = x * c00 + y * c01 + z * c02 + c03      # screen[:, 0]
    s1 = x * c10 + y * c11 + z * c12 + c13      # screen[:, 1]
    w = x * c30 + y * c31 + z * c32 + c33       # screen[:, 3]

    # EUP approximate reciprocal + one Newton-Raphson step (~f32 accuracy);
    # keeps the divide off the VALU slots.
    rcp = pl.reciprocal(w, approx=True)
    rcp = rcp * (2.0 - w * rcp)

    ty = -(s1 * rcp)                   # screen_yx[:, 0] = s1 / -w
    tx = s0 * rcp                      # screen_yx[:, 1] = s0 /  w

    dy = py - ty
    dx = px - tx
    sq = dy * dy + dx * dx             # (R, 128) per-point squared-error sum

    if total_elems > n_valid:          # static: is there any padding at all?
        g = s * tiles_per_split + t                  # global tile index
        first_pad_tile = n_valid // tile_elems       # static

        @pl.when(g >= first_pad_tile)                # only padded tiles pay
        def _masked():
            idx = (lax.broadcasted_iota(jnp.int32, sq.shape, 0) * _LANE
                   + lax.broadcasted_iota(jnp.int32, sq.shape, 1))
            rem = n_valid - g * tile_elems           # may be <= 0 (fully padded)
            # jnp.where (select) so inf/nan from padded (0,0,0) points with a
            # degenerate w-row never propagate into the sum.
            acc_ref[...] += jnp.where(idx < rem, sq, jnp.float32(0.0))

        @pl.when(g < first_pad_tile)
        def _unmasked():
            acc_ref[...] += sq
    else:
        acc_ref[...] += sq

    # Single cross-lane reduce + output store per split.
    @pl.when(t == pl.num_programs(1) - 1)
    def _finalize():
        total = jnp.sum(acc_ref[...])
        out_ref[...] = jnp.broadcast_to(total, out_ref.shape).astype(jnp.float32)


def tracking_loss(position, target_position, cam, *, tile_n=262144):
    """position: (N,2), target_position: (N,3), cam: (4,4) -> scalar f32 loss."""
    n = position.shape[0]
    if n == 0:
        return jnp.float32(jnp.nan)    # matches torch.mean over an empty tensor

    rows_total = _cdiv(n, _LANE)
    # 2-way split (per-core partials for v7x megacore); degrade to one split
    # when there is too little work.
    splits = 2 if rows_total >= 2 * _SUBLANE else 1
    max_rows_per_tile = max(_SUBLANE,
                            (max(tile_n, _LANE) // _LANE) // _SUBLANE * _SUBLANE)
    tiles_per_split = _cdiv(_cdiv(rows_total, splits), max_rows_per_tile)
    num_tiles = splits * tiles_per_split
    rows_per_tile = _round_up(_cdiv(rows_total, num_tiles), _SUBLANE)
    rows_padded = num_tiles * rows_per_tile
    n_pad = rows_padded * _LANE
    tile_elems = rows_per_tile * _LANE

    # Pack position + target into a single lane/sublane-dense (5, rows, 128)
    # slab: one input DMA per grid step, fully occupied vregs in the kernel.
    # TODO(synk): this transpose/pad/concat is one extra HBM pass over the
    # inputs; keep producers in (C, N) layout (or fuse the projection upstream)
    # to remove it for large N.
    packed = jnp.concatenate(
        [position.astype(jnp.float32).T, target_position.astype(jnp.float32).T],
        axis=0)                                            # (5, N)
    packed = jnp.pad(packed, ((0, 0), (0, n_pad - n)))     # (5, n_pad)
    packed = packed.reshape(5, rows_padded, _LANE)         # (5, rows, 128)

    kernel = functools.partial(
        _tracking_loss_kernel,
        tiles_per_split=tiles_per_split,
        tile_elems=tile_elems,
        n_valid=n,
        total_elems=n_pad,
    )

    block_bytes = 5 * rows_per_tile * _LANE * 4
    acc_bytes = rows_per_tile * _LANE * 4
    vmem_limit = int(min(120 * 2**20,
                         max(32 * 2**20, 2 * block_bytes + acc_bytes + (4 << 20))))

    out = pl.pallas_call(
        kernel,
        out_shape=jax.ShapeDtypeStruct((splits * _SUBLANE, _LANE), jnp.float32),
        grid=(splits, tiles_per_split),
        in_specs=[
            pl.BlockSpec((5, rows_per_tile, _LANE),
                         lambda s, t: (0, s * tiles_per_split + t, 0)),
            pl.BlockSpec(memory_space=pltpu.MemorySpace.SMEM),   # cam (4,4) scalars
        ],
        out_specs=pl.BlockSpec((_SUBLANE, _LANE), lambda s, t: (s, 0)),
        scratch_shapes=[pltpu.VMEM((rows_per_tile, _LANE), jnp.float32)],
        compiler_params=pltpu.CompilerParams(
            dimension_semantics=("parallel", "arbitrary"),
            vmem_limit_bytes=vmem_limit),
    )(packed, cam.astype(jnp.float32))

    partials = out.reshape(splits, _SUBLANE, _LANE)[:, 0, 0]     # per-split sums
    return jnp.sum(partials) / jnp.float32(2 * n)


def tracking_loss_ref(position, target_position, cam):
    """Pure-JAX reference mirroring the PyTorch module."""
    n = target_position.shape[0]
    world_xyzw = jnp.concatenate(
        [target_position, jnp.ones((n, 1), jnp.float32)], axis=1)
    screen_yxzw = world_xyzw @ cam.T
    screen_yx = jnp.stack(
        [screen_yxzw[:, 1] / -screen_yxzw[:, -1],
         screen_yxzw[:, 0] / screen_yxzw[:, -1]],
        axis=1,
    )
    return jnp.mean((position - screen_yx) ** 2)


if __name__ == "__main__":
    # Deterministic "camera_view_matrix" (would normally come from the env config).
    cam = jnp.array(
        [
            [1.2, 0.1, 0.0, 0.3],
            [0.0, 1.5, 0.2, -0.4],
            [0.1, 0.0, 1.0, 2.0],
            [0.0, 0.2, -0.5, 4.0],   # homogeneous w row kept away from zero
        ],
        dtype=jnp.float32,
    )

    key = jax.random.PRNGKey(0)
    k1, k2, k3, k4, k5, k6 = jax.random.split(key, 6)

    # Small case (typical per-frame object count from the module).
    pos_small = jax.random.normal(k1, (8, 2), dtype=jnp.float32)
    tgt_small = jax.random.normal(k2, (8, 3), dtype=jnp.float32)
    loss_small = jax.block_until_ready(tracking_loss(pos_small, tgt_small, cam))
    ref_small = tracking_loss_ref(pos_small, tgt_small, cam)
    assert jnp.allclose(loss_small, ref_small, rtol=1e-4, atol=1e-5), (loss_small, ref_small)

    # Larger case: 2-way split + multi-row tiles + padded last tile.
    pos_big = jax.random.normal(k3, (2500, 2), dtype=jnp.float32)
    tgt_big = jax.random.normal(k4, (2500, 3), dtype=jnp.float32)
    loss_big = jax.block_until_ready(tracking_loss(pos_big, tgt_big, cam))
    ref_big = tracking_loss_ref(pos_big, tgt_big, cam)
    assert jnp.allclose(loss_big, ref_big, rtol=1e-4, atol=1e-5), (loss_big, ref_big)

    # Exact multiple of the tile size: exercises the no-mask fast path.
    pos_ex = jax.random.normal(k5, (4096, 2), dtype=jnp.float32)
    tgt_ex = jax.random.normal(k6, (4096, 3), dtype=jnp.float32)
    loss_ex = jax.block_until_ready(tracking_loss(pos_ex, tgt_ex, cam))
    ref_ex = tracking_loss_ref(pos_ex, tgt_ex, cam)
    assert jnp.allclose(loss_ex, ref_ex, rtol=1e-4, atol=1e-5), (loss_ex, ref_ex)

    print("KERNEL_OK")
</pallas_src>

<mosaic_0001>
module attributes {stable_mosaic.version = 11 : i64} {
  func.func @_tracking_loss_kernel(%arg0: i32, %arg1: i32, %arg2: memref<5x8x128xf32, #tpu.memory_space<vmem>>, %arg3: memref<4x4xf32, #tpu.memory_space<smem>>, %arg4: memref<8x128xf32, #tpu.memory_space<vmem>>, %arg5: memref<8x128xf32, #tpu.memory_space<vmem>>) attributes {dimension_semantics = [#tpu.dimension_semantics<parallel>, #tpu.dimension_semantics<arbitrary>], iteration_bounds = array<i64: 1, 1>, scalar_prefetch = 0 : i64, scratch_operands = 1 : i64, tpu.core_type = #tpu.core_type<tc>, window_params = [{transform_indices = @transform_0, window_bounds = array<i64: 5, 8, 128>}, {transform_indices = @transform_1, window_bounds = array<i64: 4, 4>}, {transform_indices = @transform_2, window_bounds = array<i64: 8, 128>}]} {
    %c0_i32 = arith.constant 0 : i32
    %0 = arith.cmpi eq, %arg1, %c0_i32 : i32
    %1 = arith.extui %0 : i1 to i32
    %c0_i32_0 = arith.constant 0 : i32
    %2 = arith.cmpi ne, %1, %c0_i32_0 : i32
    scf.if %2 {
      %cst_42 = arith.constant 0.000000e+00 : f32
      %80 = vector.broadcast %cst_42 : f32 to vector<8x128xf32>
      %c0_43 = arith.constant 0 : index
      %c0_44 = arith.constant 0 : index
      %81 = vector.load %arg5[%c0_43, %c0_44] : memref<8x128xf32, #tpu.memory_space<vmem>>, vector<8x128xf32>
      tpu.vector_store %arg5[%c0_43, %c0_44], %80 {strides = array<i32>} : memref<8x128xf32, #tpu.memory_space<vmem>>, vector<8x128xf32>,
    } else {
    }
    %c0 = arith.constant 0 : index
    %c0_1 = arith.constant 0 : index
    %c0_2 = arith.constant 0 : index
    %3 = vector.load %arg2[%c0, %c0_1, %c0_2] : memref<5x8x128xf32, #tpu.memory_space<vmem>>, vector<1x8x128xf32>
    %4 = vector.shape_cast %3 : vector<1x8x128xf32> to vector<8x128xf32>
    %c1 = arith.constant 1 : index
    %c0_3 = arith.constant 0 : index
    %c0_4 = arith.constant 0 : index
    %5 = vector.load %arg2[%c1, %c0_3, %c0_4] : memref<5x8x128xf32, #tpu.memory_space<vmem>>, vector<1x8x128xf32>
    %6 = vector.shape_cast %5 : vector<1x8x128xf32> to vector<8x128xf32>
    %c2 = arith.constant 2 : index
    %c0_5 = arith.constant 0 : index
    %c0_6 = arith.constant 0 : index
    %7 = vector.load %arg2[%c2, %c0_5, %c0_6] : memref<5x8x128xf32, #tpu.memory_space<vmem>>, vector<1x8x128xf32>
    %8 = vector.shape_cast %7 : vector<1x8x128xf32> to vector<8x128xf32>
    %c3 = arith.constant 3 : index
    %c0_7 = arith.constant 0 : index
    %c0_8 = arith.constant 0 : index
    %9 = vector.load %arg2[%c3, %c0_7, %c0_8] : memref<5x8x128xf32, #tpu.memory_space<vmem>>, vector<1x8x128xf32>
    %10 = vector.shape_cast %9 : vector<1x8x128xf32> to vector<8x128xf32>
    %c4 = arith.constant 4 : index
    %c0_9 = arith.constant 0 : index
    %c0_10 = arith.constant 0 : index
    %11 = vector.load %arg2[%c4, %c0_9, %c0_10] : memref<5x8x128xf32, #tpu.memory_space<vmem>>, vector<1x8x128xf32>
    %12 = vector.shape_cast %11 : vector<1x8x128xf32> to vector<8x128xf32>
    %c0_11 = arith.constant 0 : index
    %c0_12 = arith.constant 0 : index
    %13 = memref.load %arg3[%c0_11, %c0_12] : memref<4x4xf32, #tpu.memory_space<smem>>
    %c0_13 = arith.constant 0 : index
    %c1_14 = arith.constant 1 : index
    %14 = memref.load %arg3[%c0_13, %c1_14] : memref<4x4xf32, #tpu.memory_space<smem>>
    %c0_15 = arith.constant 0 : index
    %c2_16 = arith.constant 2 : index
    %15 = memref.load %arg3[%c0_15, %c2_16] : memref<4x4xf32, #tpu.memory_space<smem>>
    %c0_17 = arith.constant 0 : index
    %c3_18 = arith.constant 3 : index
    %16 = memref.load %arg3[%c0_17, %c3_18] : memref<4x4xf32, #tpu.memory_space<smem>>
    %c1_19 = arith.constant 1 : index
    %c0_20 = arith.constant 0 : index
    %17 = memref.load %arg3[%c1_19, %c0_20] : memref<4x4xf32, #tpu.memory_space<smem>>
    %c1_21 = arith.constant 1 : index
    %c1_22 = arith.constant 1 : index
    %18 = memref.load %arg3[%c1_21, %c1_22] : memref<4x4xf32, #tpu.memory_space<smem>>
    %c1_23 = arith.constant 1 : index
    %c2_24 = arith.constant 2 : index
    %19 = memref.load %arg3[%c1_23, %c2_24] : memref<4x4xf32, #tpu.memory_space<smem>>
    %c1_25 = arith.constant 1 : index
    %c3_26 = arith.constant 3 : index
    %20 = memref.load %arg3[%c1_25, %c3_26] : memref<4x4xf32, #tpu.memory_space<smem>>
    %c3_27 = arith.constant 3 : index
    %c0_28 = arith.constant 0 : index
    %21 = memref.load %arg3[%c3_27, %c0_28] : memref<4x4xf32, #tpu.memory_space<smem>>
    %c3_29 = arith.constant 3 : index
    %c1_30 = arith.constant 1 : index
    %22 = memref.load %arg3[%c3_29, %c1_30] : memref<4x4xf32, #tpu.memory_space<smem>>
    %c3_31 = arith.constant 3 : index
    %c2_32 = arith.constant 2 : index
    %23 = memref.load %arg3[%c3_31, %c2_32] : memref<4x4xf32, #tpu.memory_space<smem>>
    %c3_33 = arith.constant 3 : index
    %c3_34 = arith.constant 3 : index
    %24 = memref.load %arg3[%c3_33, %c3_34] : memref<4x4xf32, #tpu.memory_space<smem>>
    %25 = vector.broadcast %13 : f32 to vector<8x128xf32>
    %26 = arith.mulf %8, %25 : vector<8x128xf32>
    %27 = vector.broadcast %14 : f32 to vector<8x128xf32>
    %28 = arith.mulf %10, %27 : vector<8x128xf32>
    %29 = arith.addf %26, %28 : vector<8x128xf32>
    %30 = vector.broadcast %15 : f32 to vector<8x128xf32>
    %31 = arith.mulf %12, %30 : vector<8x128xf32>
    %32 = arith.addf %29, %31 : vector<8x128xf32>
    %33 = vector.broadcast %16 : f32 to vector<8x128xf32>
    %34 = arith.addf %32, %33 : vector<8x128xf32>
    %35 = vector.broadcast %17 : f32 to vector<8x128xf32>
    %36 = arith.mulf %8, %35 : vector<8x128xf32>
    %37 = vector.broadcast %18 : f32 to vector<8x128xf32>
    %38 = arith.mulf %10, %37 : vector<8x128xf32>
    %39 = arith.addf %36, %38 : vector<8x128xf32>
    %40 = vector.broadcast %19 : f32 to vector<8x128xf32>
    %41 = arith.mulf %12, %40 : vector<8x128xf32>
    %42 = arith.addf %39, %41 : vector<8x128xf32>
    %43 = vector.broadcast %20 : f32 to vector<8x128xf32>
    %44 = arith.addf %42, %43 : vector<8x128xf32>
    %45 = vector.broadcast %21 : f32 to vector<8x128xf32>
    %46 = arith.mulf %8, %45 : vector<8x128xf32>
    %47 = vector.broadcast %22 : f32 to vector<8x128xf32>
    %48 = arith.mulf %10, %47 : vector<8x128xf32>
    %49 = arith.addf %46, %48 : vector<8x128xf32>
    %50 = vector.broadcast %23 : f32 to vector<8x128xf32>
    %51 = arith.mulf %12, %50 : vector<8x128xf32>
    %52 = arith.addf %49, %51 : vector<8x128xf32>
    %53 = vector.broadcast %24 : f32 to vector<8x128xf32>
    %54 = arith.addf %52, %53 : vector<8x128xf32>
    %55 = tpu.reciprocal %54 {approx = true} : vector<8x128xf32> -> vector<8x128xf32>
    %56 = arith.mulf %54, %55 : vector<8x128xf32>
    %cst = arith.constant 2.000000e+00 : f32
    %57 = vector.broadcast %cst : f32 to vector<8x128xf32>
    %58 = arith.subf %57, %56 : vector<8x128xf32>
    %59 = arith.mulf %55, %58 : vector<8x128xf32>
    %60 = arith.mulf %44, %59 : vector<8x128xf32>
    %cst_35 = arith.constant 0.000000e+00 : f32
    %61 = vector.broadcast %cst_35 : f32 to vector<8x128xf32>
    %62 = arith.subf %61, %60 : vector<8x128xf32>
    %63 = arith.mulf %34, %59 : vector<8x128xf32>
    %64 = arith.subf %4, %62 : vector<8x128xf32>
    %65 = arith.subf %6, %63 : vector<8x128xf32>
    %66 = arith.mulf %64, %64 : vector<8x128xf32>
    %67 = arith.mulf %65, %65 : vector<8x128xf32>
    %68 = arith.addf %66, %67 : vector<8x128xf32>
    %c1_i32 = arith.constant 1 : i32
    %69 = arith.muli %arg0, %c1_i32 : i32
    %70 = arith.addi %69, %arg1 : i32
    %c0_i32_36 = arith.constant 0 : i32
    %71 = arith.cmpi sge, %70, %c0_i32_36 : i32
    %72 = arith.extui %71 : i1 to i32
    %c0_i32_37 = arith.constant 0 : i32
    %73 = arith.cmpi ne, %72, %c0_i32_37 : i32
    scf.if %73 {
      %80 = tpu.iota {dimensions = array<i32: 0>} : vector<8x128xi32>
      %c128_i32 = arith.constant 128 : i32
      %81 = vector.broadcast %c128_i32 : i32 to vector<8x128xi32>
      %82 = arith.muli %80, %81 : vector<8x128xi32>
      %83 = tpu.iota {dimensions = array<i32: 1>} : vector<8x128xi32>
      %84 = arith.addi %82, %83 : vector<8x128xi32>
      %c1024_i32 = arith.constant 1024 : i32
      %85 = arith.muli %70, %c1024_i32 : i32
      %c8_i32 = arith.constant 8 : i32
      %86 = arith.subi %c8_i32, %85 : i32
      %c0_42 = arith.constant 0 : index
      %c0_43 = arith.constant 0 : index
      %87 = vector.load %arg5[%c0_42, %c0_43] : memref<8x128xf32, #tpu.memory_space<vmem>>, vector<8x128xf32>
      %88 = vector.broadcast %86 : i32 to vector<8x128xi32>
      %89 = arith.cmpi slt, %84, %88 : vector<8x128xi32>
      %cst_44 = arith.constant 0.000000e+00 : f32
      %90 = vector.broadcast %cst_44 : f32 to vector<8x128xf32>
      %91 = arith.select %89, %68, %90 : vector<8x128xi1>, vector<8x128xf32>
      %92 = arith.addf %87, %91 : vector<8x128xf32>
      %c0_45 = arith.constant 0 : index
      %c0_46 = arith.constant 0 : index
      %93 = vector.load %arg5[%c0_45, %c0_46] : memref<8x128xf32, #tpu.memory_space<vmem>>, vector<8x128xf32>
      tpu.vector_store %arg5[%c0_45, %c0_46], %92 {strides = array<i32>} : memref<8x128xf32, #tpu.memory_space<vmem>>, vector<8x128xf32>,
    } else {
    }
    %c0_i32_38 = arith.constant 0 : i32
    %74 = arith.cmpi slt, %70, %c0_i32_38 : i32
    %75 = arith.extui %74 : i1 to i32
    %c0_i32_39 = arith.constant 0 : i32
    %76 = arith.cmpi ne, %75, %c0_i32_39 : i32
    scf.if %76 {
      %c0_42 = arith.constant 0 : index
      %c0_43 = arith.constant 0 : index
      %80 = vector.load %arg5[%c0_42, %c0_43] : memref<8x128xf32, #tpu.memory_space<vmem>>, vector<8x128xf32>
      %81 = arith.addf %80, %68 : vector<8x128xf32>
      %c0_44 = arith.constant 0 : index
      %c0_45 = arith.constant 0 : index
      %82 = vector.load %arg5[%c0_44, %c0_45] : memref<8x128xf32, #tpu.memory_space<vmem>>, vector<8x128xf32>
      tpu.vector_store %arg5[%c0_44, %c0_45], %81 {strides = array<i32>} : memref<8x128xf32, #tpu.memory_space<vmem>>, vector<8x128xf32>,
    } else {
    }
    %c0_i32_40 = arith.constant 0 : i32
    %77 = arith.cmpi eq, %arg1, %c0_i32_40 : i32
    %78 = arith.extui %77 : i1 to i32
    %c0_i32_41 = arith.constant 0 : i32
    %79 = arith.cmpi ne, %78, %c0_i32_41 : i32
    scf.if %79 {
      %c0_42 = arith.constant 0 : index
      %c0_43 = arith.constant 0 : index
      %80 = vector.load %arg5[%c0_42, %c0_43] : memref<8x128xf32, #tpu.memory_space<vmem>>, vector<8x128xf32>
      %81 = vector.shape_cast %80 : vector<8x128xf32> to vector<1x8x128xf32>
      %cst_44 = arith.constant dense<0.000000e+00> : vector<1xf32>
      %82 = vector.multi_reduction <add>, %81, %cst_44 [1, 2] : vector<1x8x128xf32> to vector<1xf32>
      %83 = vector.shape_cast %82 : vector<1xf32> to vector<1x1x1xf32>
      %84 = vector.extract %83[0, 0, 0] : f32 from vector<1x1x1xf32>
      %85 = vector.broadcast %84 : f32 to vector<8x128xf32>
      %c0_45 = arith.constant 0 : index
      %c0_46 = arith.constant 0 : index
      %86 = vector.load %arg4[%c0_45, %c0_46] : memref<8x128xf32, #tpu.memory_space<vmem>>, vector<8x128xf32>
      tpu.vector_store %arg4[%c0_45, %c0_46], %85 {strides = array<i32>} : memref<8x128xf32, #tpu.memory_space<vmem>>, vector<8x128xf32>,
    } else {
    }
    return
  }
  func.func @transform_0(%arg0: i32, %arg1: i32) -> (i32, i32, i32) {
    %c1_i32 = arith.constant 1 : i32
    %0 = arith.muli %arg0, %c1_i32 : i32
    %1 = arith.addi %0, %arg1 : i32
    %c0_i32 = arith.constant 0 : i32
    %c0_i32_0 = arith.constant 0 : i32
    %c0_i32_1 = arith.constant 0 : i32
    return %c0_i32, %1, %c0_i32_0 : i32, i32, i32
  }
  func.func @transform_1(%arg0: i32, %arg1: i32) -> (i32, i32) {
    %c0_i32 = arith.constant 0 : i32
    %c0_i32_0 = arith.constant 0 : i32
    %c0_i32_1 = arith.constant 0 : i32
    return %c0_i32, %c0_i32_0 : i32, i32
  }
  func.func @transform_2(%arg0: i32, %arg1: i32) -> (i32, i32) {
    %c0_i32 = arith.constant 0 : i32
    %c0_i32_0 = arith.constant 0 : i32
    return %arg0, %c0_i32 : i32, i32
  }
}

</mosaic_0001>

<bundles_post_ra>
// kernel: tpu_custom_call.1
= control target key start
LH: loop header
LB: loop body
LE: loop exit
PB: predicated region body
PF: predicated region fallthrough
CT: control target
= control target key end

     0   :  { %7 = vsyncpa [#allocation4], 0  ;;  %s287_s0 = inlined_call_operand.hbm [shape: f32[5,8,128], index: 0, kind: input, shape index: {}]   ;;  %s288_s1 = inlined_call_operand.hbm [shape: f32[4,4], index: 1, kind: input, shape index: {}]   ;;  %s289_s2 = inlined_call_operand.hbm [shape: f32[8,128], index: 2, kind: output, shape index: {}]  }
   0x1   :  { %8 = vsyncpa [#allocation6], 0 }
   0x2   :  { %9 = vsyncpa [#allocation5], 0  ;;  %s17_s11 = sshll.u32 %s287_s0, 4  ;;  %s258_s12 = smov [#allocation3]   ;;  %s18_s11 = int_to_ptr.hbm [resolvable:$true] %s17_s11 }
   0x3   :  { %s19_s13 = sshll.u32 %s258_s12, 4  ;;  %s31_s16 = sshll.u32 %s288_s1, 4  ;;  %s20_s13 = int_to_ptr.vmem [resolvable:$true] %s19_s13  ;;  %s32_s16 = int_to_ptr.hbm [resolvable:$true] %s31_s16 }
   0x4   :  { %s259_s17 = smov 128   ;;  %s260_s18 = smov 8  }
   0x5   :  { %25 = dma.hbm_to_vmem [thread:$0]  %s18_s11, 640, %s20_s13, [#allocation4], %s259_s17, %s259_s17, %s260_s18  }
   0x6   :  { %s261_s19 = smov [#allocation7]  }
   0x7   :  { %34 = dma.hbm_to_smem %s32_s16, 64, %s261_s19, [#allocation6]  }
   0x8   :  { %252 = dma.done.wait [#allocation4], 640  }
   0x9   :  { %253 = vsyncadd [#allocation4], 4294966656 }
   0xa   :  { %254 = dma.done.wait [#allocation6], 64  }
   0xb   :  { %255 = vsyncadd [#allocation6], 4294967232 }
   0xc   :  { %43 = sfence }
   0xd   :  { %s59_s0 = sld [smem:[#allocation7]]  ;;  %v54_v0 = vld [vmem:[#allocation3 + $0x10] sm:$0xff]  ;;  %v56_v1 = vld [vmem:[#allocation3 + $0x18] sm:$0xff]  ;;  %v58_v2 = vld [vmem:[#allocation3 + $0x20] sm:$0xff]  ;;  %v118_v27 = vlaneseq  ;;  %s262_s30 = smov [#allocation8]  }
   0xe   :  { %s172_s20 = sld [smem:[#allocation7 + $0x1]]  ;;  %v52_v39 = vld [vmem:[#allocation3 + $0x8] sm:$0xff]  ;;  %v50_v44 = vld [vmem:[#allocation3] sm:$0xff]  ;;  %s159_s3 = sshll.u32 %s262_s30, 4  ;;  %s160_s3 = int_to_ptr.vmem [resolvable:$true] %s159_s3 }
   0xf   :  { %s175_s21 = sld [smem:[#allocation7 + $0x80]]  ;;  %v119_v34 = vshrl.u32 %v118_v27, 7  ;;  %v122_v41 = vand.u32 127, %v118_v27  ;;  %s161_s6 = sshll.u32 %s289_s2, 4  ;;  %s162_s6 = int_to_ptr.hbm [resolvable:$true] %s161_s6 }
  0x10   :  { %s176_s22 = sld [smem:[#allocation7 + $0x81]] }
  0x11   :  { %s179_s23 = sld [smem:[#allocation7 + $0x180]]  ;;  %v120_v40 = vmul.u32 128, %v119_v34 }
  0x12   :  { %s180_s24 = sld [smem:[#allocation7 + $0x181]] }
  0x13   :  { %s181_s25 = sld [smem:[#allocation7 + $0x182]]  ;;  %v71_v8 = vstv %s59_s0  ;;  %v123_v47 = vadd.s32 %v122_v41, %v120_v40 }
  0x14   :  { %s182_s26 = sld [smem:[#allocation7 + $0x183]]  ;;  %v73_v10 = vstv %s172_s20  ;;  %v72_v16 = vmul.f32 %v71_v8, %v54_v0 }
  0x15   :  { %s173_s1 = sld [smem:[#allocation7 + $0x2]]  ;;  %v81_v11 = vstv %s175_s21  ;;  %v74_v17 = vmul.f32 %v73_v10, %v56_v1  ;;  %vm128_vm0 = vcmp.lt.s32.totalorder %v123_v47, 8 }
  0x16   :  { %s177_s27 = sld [smem:[#allocation7 + $0x82]]  ;;  %v83_v12 = vstv %s176_s22  ;;  %v82_v18 = vmul.f32 %v81_v11, %v54_v0 }
  0x17   :  { %v91_v3 = vstv %s179_s23  ;;  %s174_s28 = sld [smem:[#allocation7 + $0x3]]  ;;  %v84_v19 = vmul.f32 %v83_v12, %v56_v1  ;;  %v75_v23 = vadd.f32 %v74_v17, %v72_v16 }
  0x18   :  { %v92_v4 = vmul.f32 %v91_v3, %v54_v0  ;;  %v93_v5 = vstv %s180_s24  ;;  %s178_s29 = sld [smem:[#allocation7 + $0x83]] }
  0x19   :  { %v94_v6 = vmul.f32 %v93_v5, %v56_v1  ;;  %v96_v7 = vstv %s181_s25  ;;  %v85_v25 = vadd.f32 %v84_v19, %v82_v18 }
  0x1a   :  { %v97_v9 = vmul.f32 %v96_v7, %v58_v2  ;;  %v99_v14 = vstv %s182_s26 }
  0x1b   :  { %v95_v13 = vadd.f32 %v94_v6, %v92_v4  ;;  %v76_v20 = vstv %s173_s1 }
  0x1c   :  { %v86_v21 = vstv %s177_s27  ;;  %v77_v24 = vmul.f32 %v76_v20, %v58_v2 }
  0x1d   :  { %v98_v15 = vadd.f32 %v97_v9, %v95_v13  ;;  %v87_v26 = vmul.f32 %v86_v21, %v58_v2  ;;  %v79_v31 = vstv %s174_s28 }
  0x1e   :  { %v78_v28 = vadd.f32 %v77_v24, %v75_v23  ;;  %v89_v32 = vstv %s178_s29 }
  0x1f   :  { %v100_v22 = vadd.f32 %v99_v14, %v98_v15  ;;  %v88_v29 = vadd.f32 %v87_v26, %v85_v25 }
  0x20   :  { %v80_v35 = vadd.f32 %v79_v31, %v78_v28 }
  0x21   :  { %190 = vrcp.f32 %v100_v22  ;;  %v90_v36 = vadd.f32 %v89_v32, %v88_v29 }
  0x27   :  { %v191_v30 = vpop.eup %190 }
  0x28   :  { %v102_v33 = vmul.f32 %v191_v30, %v100_v22 }
  0x2a   :  { %v103_v37 = vsub.f32 2.0, %v102_v33 }
  0x2c   :  { %v104_v38 = vmul.f32 %v191_v30, %v103_v37 }
  0x2e   :  { %v105_v42 = vmul.f32 %v104_v38, %v90_v36  ;;  %v107_v43 = vmul.f32 %v104_v38, %v80_v35 }
  0x30   :  { %v106_v45 = vsub.f32 0.0, %v105_v42  ;;  %v109_v46 = vsub.f32 %v52_v39, %v107_v43 }
  0x32   :  { %v108_v48 = vsub.f32 %v50_v44, %v106_v45  ;;  %v111_v49 = vmul.f32 %v109_v46, %v109_v46 }
  0x34   :  { %v110_v50 = vmul.f32 %v108_v48, %v108_v48 }
  0x36   :  { %v112_v51 = vadd.f32 %v111_v49, %v110_v50 }
  0x38   :  { %v129_v52 = vsel %vm128_vm0, %v112_v51, 0.0 }
  0x39   :  { %143 = vadd.xlane.f32.xlu0 %v129_v52 }
  0xac   :  { %v144_v53 = vpop.xlane.xlu0 %143 }
  0xad   :  { %v145_v54 = vrot.slane %v144_v53, 4 }
  0xaf   :  { %v146_v55 = vadd.f32 %v145_v54, %v144_v53 }
  0xb1   :  { %v147_v56 = vrot.slane %v146_v55, 2 }
  0xb3   :  { %v148_v57 = vadd.f32 %v147_v56, %v146_v55 }
  0xb5   :  { %v149_v58 = vrot.slane %v148_v57, 1 }
  0xb7   :  { %v150_v59 = vadd.f32 %v149_v58, %v148_v57 }
  0xb9   :  { %183 = vpush %v150_v59 }
  0xea   :  { %s184_s7 = spop %183 }
  0xeb   :  { %v152_v60 = vstv %s184_s7 }
  0xec   :  { %153 = vst [vmem:[#allocation8] sm:$0xff] %v152_v60 }
  0xed   :  { %164 = dma.vmem_to_hbm [thread:$0]  %s160_s3, 128, %s162_s6, [#allocation5]  }
  0xee   :  { %256 = dma.done.wait [#allocation5], 128  }
  0xef   :  { %257 = vsyncadd [#allocation5], 4294967168 }
  0xf0   :  { %169 = vsyncpa [#allocation4], 1 }
  0xf1   :  { %170 = vsyncpa [#allocation5], 1 }
  0xf2   :  { %171 = vsyncpa [#allocation6], 1 }

</bundles_post_ra>
